<compile_context>
chip_gen: v7x
topology: tpu7x:2x2x1
jax: 0.10.0
libtpu: 0.0.40
codegen_flags: <defaults>
</compile_context>

<pallas_src>
import math

import jax
import jax.numpy as jnp
from jax.experimental import pallas as pl
from jax.experimental.pallas import tpu as pltpu


def _tv_kernel(x_ref, mask_ref, h_ref, w_ref, acc_h, acc_w):
    # grid = (NCORES, blocks_per_core); axis 1 is the accumulation axis.
    i = pl.program_id(1)

    @pl.when(i == 0)
    def _init():
        acc_h[...] = jnp.zeros_like(acc_h)
        acc_w[...] = jnp.zeros_like(acc_w)

    x = x_ref[...].astype(jnp.float32)                    # (TR, W)

    # Vertical diffs between consecutive rows; mask zeroes the rows that
    # straddle two different (H, W) planes.
    dh = (x[1:, :] - x[:-1, :]) * mask_ref[...]           # (TR-1, W)
    # Horizontal diffs are always within a plane row; no mask needed.
    dw = x[:, 1:] - x[:, :-1]                             # (TR, W-1)

    # Pure element-wise accumulation per step (VPU only).
    acc_h[...] += dh * dh
    acc_w[...] += dw * dw

    # Deferred cross-lane/sublane reduction + scalar store, once per core.
    @pl.when(i == pl.num_programs(1) - 1)
    def _finalize():
        h_ref[0] = jnp.sum(acc_h[...], axis=(0, 1), keepdims=True)
        w_ref[0] = jnp.sum(acc_w[...], axis=(0, 1), keepdims=True)


def tv_loss(x, tv_loss_weight=1.0):
    """Pallas TV loss matching the PyTorch TVLoss.forward semantics (NCHW)."""
    B, C, H, W = x.shape
    n_planes = B * C

    # ---- choose planes-per-block k so that the f32 block is ~2 MiB and
    # ---- TR = k*H is a multiple of 8 (sublane tiling constraint).
    plane_f32 = H * W * 4
    m = 8 // math.gcd(H, 8)                       # smallest k making k*H % 8 == 0
    k_budget = max(1, (2 * 1024 * 1024) // plane_f32)
    k = max(m, (k_budget // m) * m)
    k = min(k, pl.cdiv(n_planes, m) * m)          # don't over-pad tiny inputs
    # NOTE: for pathologically huge planes with H not a multiple of 8, k==m may
    # exceed the 2 MiB target; typical image shapes are unaffected.
    TR = k * H

    num_blocks = pl.cdiv(n_planes, k)
    ncores = 2 if num_blocks >= 2 else 1          # shard across v7x's 2 TCs
    blocks_per_core = pl.cdiv(num_blocks, ncores)
    padded_planes = ncores * blocks_per_core * k

    # ---- lane/sublane-friendly 2D layout: (planes*H, W), zero-pad extra planes
    # ---- (zero planes contribute nothing to either sum).
    x2 = x.reshape(n_planes * H, W)
    pad_rows = (padded_planes - n_planes) * H
    if pad_rows:
        x2 = jnp.pad(x2, ((0, pad_rows), (0, 0)))

    # Mask for vertical diffs: diff row r (pairs rows r, r+1 of the block) is a
    # real within-plane diff iff r % H != H-1.  Blocks start at plane boundaries.
    r = jnp.arange(TR - 1)
    mask_h = (r % H != (H - 1)).astype(jnp.float32).reshape(TR - 1, 1)

    # ---- VMEM budget: double-buffered input + 2 accumulators + f32 temporaries.
    itemsize = jnp.dtype(x.dtype).itemsize
    blk_in = TR * W * itemsize
    blk_f32 = TR * W * 4
    vmem_limit = int(min(48 * 1024 * 1024,                 # < v7x 64 MiB physical
                         max(16 * 1024 * 1024,
                             2 * blk_in + 10 * blk_f32 + (4 << 20))))

    h_part, w_part = pl.pallas_call(
        _tv_kernel,
        out_shape=(jax.ShapeDtypeStruct((ncores, 1, 1), jnp.float32),
                   jax.ShapeDtypeStruct((ncores, 1, 1), jnp.float32)),
        grid_spec=pltpu.PrefetchScalarGridSpec(
            num_scalar_prefetch=0,
            grid=(ncores, blocks_per_core),
            in_specs=[
                pl.BlockSpec((TR, W),
                             lambda c, i: (c * blocks_per_core + i, 0)),
                pl.BlockSpec((TR - 1, 1), lambda c, i: (0, 0)),   # resident mask
            ],
            out_specs=[
                pl.BlockSpec((1, 1, 1), lambda c, i: (c, 0, 0)),
                pl.BlockSpec((1, 1, 1), lambda c, i: (c, 0, 0)),
            ],
            scratch_shapes=[
                pltpu.VMEM((TR - 1, W), jnp.float32),   # acc for vertical diffs
                pltpu.VMEM((TR, W - 1), jnp.float32),   # acc for horizontal diffs
            ],
        ),
        compiler_params=pltpu.CompilerParams(
            dimension_semantics=("parallel", "arbitrary"),
            vmem_limit_bytes=vmem_limit,
        ),
    )(x2, mask_h)

    h_tv = jnp.sum(h_part)
    w_tv = jnp.sum(w_part)
    count_h = C * (H - 1) * W
    count_w = C * H * (W - 1)
    return tv_loss_weight * 2.0 * (h_tv / count_h + w_tv / count_w) / B


def _tv_loss_ref(x, tv_loss_weight=1.0):
    B, C, H, W = x.shape
    count_h = C * (H - 1) * W
    count_w = C * H * (W - 1)
    h_tv = jnp.sum((x[:, :, 1:, :] - x[:, :, :H - 1, :]) ** 2)
    w_tv = jnp.sum((x[:, :, :, 1:] - x[:, :, :, :W - 1]) ** 2)
    return tv_loss_weight * 2.0 * (h_tv / count_h + w_tv / count_w) / B


if __name__ == "__main__":
    key = jax.random.PRNGKey(0)
    # small NCHW shapes consistent with the module
    x = jax.random.normal(key, (2, 4, 16, 16), dtype=jnp.float32)

    out = jax.block_until_ready(tv_loss(x, tv_loss_weight=1.0))
    ref = _tv_loss_ref(x, tv_loss_weight=1.0)
    assert jnp.allclose(out, ref, rtol=1e-5, atol=1e-5), (out, ref)

    print("KERNEL_OK")
</pallas_src>

<mosaic_0001>
module attributes {stable_mosaic.version = 11 : i64} {
  func.func @_tv_kernel(%arg0: i32, %arg1: i32, %arg2: memref<128x16xf32, #tpu.memory_space<vmem>>, %arg3: memref<127x1xf32, #tpu.memory_space<vmem>>, %arg4: memref<1x1x1xf32, #tpu.memory_space<vmem>>, %arg5: memref<1x1x1xf32, #tpu.memory_space<vmem>>, %arg6: memref<127x16xf32, #tpu.memory_space<vmem>>, %arg7: memref<128x15xf32, #tpu.memory_space<vmem>>) attributes {dimension_semantics = [#tpu.dimension_semantics<parallel>, #tpu.dimension_semantics<arbitrary>], iteration_bounds = array<i64: 1, 1>, scalar_prefetch = 0 : i64, scratch_operands = 2 : i64, tpu.core_type = #tpu.core_type<tc>, window_params = [{transform_indices = @transform_0, window_bounds = array<i64: 128, 16>}, {pipeline_mode = #tpu.pipeline_mode<synchronous>, transform_indices = @transform_1, window_bounds = array<i64: 127, 1>}, {transform_indices = @transform_2, window_bounds = array<i64: 1, 1, 1>}, {transform_indices = @transform_3, window_bounds = array<i64: 1, 1, 1>}]} {
    %c0_i32 = arith.constant 0 : i32
    %0 = arith.cmpi eq, %arg1, %c0_i32 : i32
    %1 = arith.extui %0 : i1 to i32
    %c0_i32_0 = arith.constant 0 : i32
    %2 = arith.cmpi ne, %1, %c0_i32_0 : i32
    scf.if %2 {
      %cst = arith.constant 0.000000e+00 : f32
      %24 = vector.broadcast %cst : f32 to vector<127x16xf32>
      %c0_14 = arith.constant 0 : index
      %c0_15 = arith.constant 0 : index
      %25 = vector.load %arg6[%c0_14, %c0_15] : memref<127x16xf32, #tpu.memory_space<vmem>>, vector<127x16xf32>
      tpu.vector_store %arg6[%c0_14, %c0_15], %24 {strides = array<i32>} : memref<127x16xf32, #tpu.memory_space<vmem>>, vector<127x16xf32>,
      %cst_16 = arith.constant 0.000000e+00 : f32
      %26 = vector.broadcast %cst_16 : f32 to vector<128x15xf32>
      %c0_17 = arith.constant 0 : index
      %c0_18 = arith.constant 0 : index
      %27 = vector.load %arg7[%c0_17, %c0_18] : memref<128x15xf32, #tpu.memory_space<vmem>>, vector<128x15xf32>
      tpu.vector_store %arg7[%c0_17, %c0_18], %26 {strides = array<i32>} : memref<128x15xf32, #tpu.memory_space<vmem>>, vector<128x15xf32>,
    } else {
    }
    %c0 = arith.constant 0 : index
    %c0_1 = arith.constant 0 : index
    %3 = vector.load %arg2[%c0, %c0_1] : memref<128x16xf32, #tpu.memory_space<vmem>>, vector<128x16xf32>
    %4 = vector.extract_strided_slice %3 {offsets = [1, 0], sizes = [127, 16], strides = [1, 1]} : vector<128x16xf32> to vector<127x16xf32>
    %5 = vector.extract_strided_slice %3 {offsets = [0, 0], sizes = [127, 16], strides = [1, 1]} : vector<128x16xf32> to vector<127x16xf32>
    %6 = arith.subf %4, %5 : vector<127x16xf32>
    %c0_2 = arith.constant 0 : index
    %c0_3 = arith.constant 0 : index
    %7 = vector.load %arg3[%c0_2, %c0_3] : memref<127x1xf32, #tpu.memory_space<vmem>>, vector<127x1xf32>
    %8 = vector.broadcast %7 : vector<127x1xf32> to vector<127x16xf32>
    %9 = arith.mulf %6, %8 : vector<127x16xf32>
    %10 = vector.extract_strided_slice %3 {offsets = [0, 1], sizes = [128, 15], strides = [1, 1]} : vector<128x16xf32> to vector<128x15xf32>
    %11 = vector.extract_strided_slice %3 {offsets = [0, 0], sizes = [128, 15], strides = [1, 1]} : vector<128x16xf32> to vector<128x15xf32>
    %12 = arith.subf %10, %11 : vector<128x15xf32>
    %c0_4 = arith.constant 0 : index
    %c0_5 = arith.constant 0 : index
    %13 = vector.load %arg6[%c0_4, %c0_5] : memref<127x16xf32, #tpu.memory_space<vmem>>, vector<127x16xf32>
    %14 = arith.mulf %9, %9 : vector<127x16xf32>
    %15 = arith.addf %13, %14 : vector<127x16xf32>
    %c0_6 = arith.constant 0 : index
    %c0_7 = arith.constant 0 : index
    %16 = vector.load %arg6[%c0_6, %c0_7] : memref<127x16xf32, #tpu.memory_space<vmem>>, vector<127x16xf32>
    tpu.vector_store %arg6[%c0_6, %c0_7], %15 {strides = array<i32>} : memref<127x16xf32, #tpu.memory_space<vmem>>, vector<127x16xf32>,
    %c0_8 = arith.constant 0 : index
    %c0_9 = arith.constant 0 : index
    %17 = vector.load %arg7[%c0_8, %c0_9] : memref<128x15xf32, #tpu.memory_space<vmem>>, vector<128x15xf32>
    %18 = arith.mulf %12, %12 : vector<128x15xf32>
    %19 = arith.addf %17, %18 : vector<128x15xf32>
    %c0_10 = arith.constant 0 : index
    %c0_11 = arith.constant 0 : index
    %20 = vector.load %arg7[%c0_10, %c0_11] : memref<128x15xf32, #tpu.memory_space<vmem>>, vector<128x15xf32>
    tpu.vector_store %arg7[%c0_10, %c0_11], %19 {strides = array<i32>} : memref<128x15xf32, #tpu.memory_space<vmem>>, vector<128x15xf32>,
    %c0_i32_12 = arith.constant 0 : i32
    %21 = arith.cmpi eq, %arg1, %c0_i32_12 : i32
    %22 = arith.extui %21 : i1 to i32
    %c0_i32_13 = arith.constant 0 : i32
    %23 = arith.cmpi ne, %22, %c0_i32_13 : i32
    scf.if %23 {
      %c0_14 = arith.constant 0 : index
      %c0_15 = arith.constant 0 : index
      %24 = vector.load %arg6[%c0_14, %c0_15] : memref<127x16xf32, #tpu.memory_space<vmem>>, vector<127x16xf32>
      %25 = vector.shape_cast %24 : vector<127x16xf32> to vector<1x127x16xf32>
      %cst = arith.constant dense<0.000000e+00> : vector<1xf32>
      %26 = vector.multi_reduction <add>, %25, %cst [1, 2] : vector<1x127x16xf32> to vector<1xf32>
      %27 = vector.shape_cast %26 : vector<1xf32> to vector<1x1x1xf32>
      %28 = vector.extract %27[0, 0, 0] : f32 from vector<1x1x1xf32>
      %29 = vector.broadcast %28 : f32 to vector<1x1xf32>
      %c0_16 = arith.constant 0 : index
      %c0_17 = arith.constant 0 : index
      %c0_18 = arith.constant 0 : index
      %30 = vector.load %arg4[%c0_16, %c0_17, %c0_18] : memref<1x1x1xf32, #tpu.memory_space<vmem>>, vector<1x1x1xf32>
      %31 = vector.shape_cast %30 : vector<1x1x1xf32> to vector<1x1xf32>
      %32 = vector.shape_cast %29 : vector<1x1xf32> to vector<1x1x1xf32>
      tpu.vector_store %arg4[%c0_16, %c0_17, %c0_18], %32 {strides = array<i32>} : memref<1x1x1xf32, #tpu.memory_space<vmem>>, vector<1x1x1xf32>,
      %c0_19 = arith.constant 0 : index
      %c0_20 = arith.constant 0 : index
      %33 = vector.load %arg7[%c0_19, %c0_20] : memref<128x15xf32, #tpu.memory_space<vmem>>, vector<128x15xf32>
      %34 = vector.shape_cast %33 : vector<128x15xf32> to vector<1x128x15xf32>
      %cst_21 = arith.constant dense<0.000000e+00> : vector<1xf32>
      %35 = vector.multi_reduction <add>, %34, %cst_21 [1, 2] : vector<1x128x15xf32> to vector<1xf32>
      %36 = vector.shape_cast %35 : vector<1xf32> to vector<1x1x1xf32>
      %37 = vector.extract %36[0, 0, 0] : f32 from vector<1x1x1xf32>
      %38 = vector.broadcast %37 : f32 to vector<1x1xf32>
      %c0_22 = arith.constant 0 : index
      %c0_23 = arith.constant 0 : index
      %c0_24 = arith.constant 0 : index
      %39 = vector.load %arg5[%c0_22, %c0_23, %c0_24] : memref<1x1x1xf32, #tpu.memory_space<vmem>>, vector<1x1x1xf32>
      %40 = vector.shape_cast %39 : vector<1x1x1xf32> to vector<1x1xf32>
      %41 = vector.shape_cast %38 : vector<1x1xf32> to vector<1x1x1xf32>
      tpu.vector_store %arg5[%c0_22, %c0_23, %c0_24], %41 {strides = array<i32>} : memref<1x1x1xf32, #tpu.memory_space<vmem>>, vector<1x1x1xf32>,
    } else {
    }
    return
  }
  func.func @transform_0(%arg0: i32, %arg1: i32) -> (i32, i32) {
    %c1_i32 = arith.constant 1 : i32
    %0 = arith.muli %arg0, %c1_i32 : i32
    %1 = arith.addi %0, %arg1 : i32
    %c0_i32 = arith.constant 0 : i32
    %c0_i32_0 = arith.constant 0 : i32
    return %1, %c0_i32 : i32, i32
  }
  func.func @transform_1(%arg0: i32, %arg1: i32) -> (i32, i32) {
    %c0_i32 = arith.constant 0 : i32
    %c0_i32_0 = arith.constant 0 : i32
    %c0_i32_1 = arith.constant 0 : i32
    return %c0_i32, %c0_i32_0 : i32, i32
  }
  func.func @transform_2(%arg0: i32, %arg1: i32) -> (i32, i32, i32) {
    %c0_i32 = arith.constant 0 : i32
    %c0_i32_0 = arith.constant 0 : i32
    %c0_i32_1 = arith.constant 0 : i32
    return %arg0, %c0_i32, %c0_i32_0 : i32, i32, i32
  }
  func.func @transform_3(%arg0: i32, %arg1: i32) -> (i32, i32, i32) {
    %c0_i32 = arith.constant 0 : i32
    %c0_i32_0 = arith.constant 0 : i32
    %c0_i32_1 = arith.constant 0 : i32
    return %arg0, %c0_i32, %c0_i32_0 : i32, i32, i32
  }
}

</mosaic_0001>

<bundles_post_ra>
// kernel: tpu_custom_call.1
= control target key start
LH: loop header
LB: loop body
LE: loop exit
PB: predicated region body
PF: predicated region fallthrough
CT: control target
= control target key end

     0   :  { %9 = vsyncpa [#allocation5], 0  ;;  %s852_s16 = smov 1   ;;  %v853_v4 = vmov 0   ;;  %s1347_s0 = inlined_call_operand.vmem [shape: f32[128,16], index: 0, kind: input, shape index: {}]   ;;  %s1348_s1 = inlined_call_operand.vmem [shape: f32[127,1], index: 1, kind: input, shape index: {}]   ;;  %s1349_s2 = inlined_call_operand.hbm [shape: f32[1,1,1], index: 2, kind: output, shape index: {0}]   ;;  %s1350_s3 = inlined_call_operand.hbm [shape: f32[1,1,1], index: 3, kind: output, shape index: {1}]  }
   0x1   :  { %v881_v0 = vld [vmem:[%s1347_s0] sm:$0xff]  ;;  %v886_v1 = vld [vmem:[%s1347_s0 + $0x10] sm:$0xff]  ;;  %v895_v2 = vld [vmem:[%s1347_s0 + $0x8] sm:$0xff]  ;;  %802 = vset.pattern.permute.xlu0 %v853_v4  ;;  %803 = vset.pattern.permute.xlu1 %v853_v4 }
   0x2   :  { %315 = vrot.lane.b32.xlu0 %v881_v0, %s852_s16  ;;  %319 = vrot.lane.b32.xlu1 %v886_v1, %s852_s16  ;;  %v900_v3 = vld [vmem:[%s1347_s0 + $0x18] sm:$0xff]  ;;  %v909_v5 = vld [vmem:[%s1347_s0 + $0x20] sm:$0xff] }
   0x3   :  { %v914_v6 = vld [vmem:[%s1347_s0 + $0x28] sm:$0xff]  ;;  %v923_v7 = vld [vmem:[%s1347_s0 + $0x30] sm:$0xff]  ;;  %v928_v8 = vld [vmem:[%s1347_s0 + $0x38] sm:$0xff] }
   0x6   :  { %317 = vrot.lane.b32.xlu0 %v895_v2, %s852_s16  ;;  %321 = vrot.lane.b32.xlu1 %v900_v3, %s852_s16 }
   0xa   :  { %323 = vrot.lane.b32.xlu0 %v909_v5, %s852_s16  ;;  %325 = vrot.lane.b32.xlu1 %v914_v6, %s852_s16 }
   0xb   :  { %10 = vsyncpa [#allocation7], 0  ;;  %v937_v9 = vld [vmem:[%s1347_s0 + $0x40] sm:$0xff]  ;;  %v942_v10 = vld [vmem:[%s1347_s0 + $0x48] sm:$0xff]  ;;  %vm41_vm0 = vcmask 130048   ;;  %v854_v23 = vmov 0.0  }
   0xc   :  { %v951_v11 = vld [vmem:[%s1347_s0 + $0x50] sm:$0xff]  ;;  %v956_v12 = vld [vmem:[%s1347_s0 + $0x58] sm:$0xff]  ;;  %v965_v13 = vld [vmem:[%s1347_s0 + $0x60] sm:$0xff]  ;;  %42 = vst.msk [vmem:[#allocation2] sm:$0xff] %vm41_vm0, %v854_v23  ;;  %vm59_vm1 = vcmask 121856   ;;  %s855_s21 = smov 127  }
   0xd   :  { %v970_v14 = vld [vmem:[%s1347_s0 + $0x68] sm:$0xff]  ;;  %v979_v15 = vld [vmem:[%s1347_s0 + $0x70] sm:$0xff]  ;;  %v984_v16 = vld [vmem:[%s1347_s0 + $0x78] sm:$0xff]  ;;  %43 = vst.msk [vmem:[#allocation2 + $0x8] sm:$0xff] %vm41_vm0, %v854_v23  ;;  %vm57_vm2 = vcmask 129024   ;;  %vm108_vm3 = vcmask 1040384  }
   0xe   :  { %327 = vrot.lane.b32.xlu0 %v923_v7, %s852_s16  ;;  %329 = vrot.lane.b32.xlu1 %v928_v8, %s852_s16  ;;  %v172_v17 = vld [vmem:[%s1348_s1] sm:$0xff]  ;;  %v173_v18 = vld [vmem:[%s1348_s1 + $0x8] sm:$0xff]  ;;  %44 = vst.msk [vmem:[#allocation2 + $0x10] sm:$0xff] %vm41_vm0, %v854_v23  ;;  %45 = vst.msk [vmem:[#allocation2 + $0x18] sm:$0xff] %vm41_vm0, %v854_v23  ;;  %vm427_vm4 = vcmask 1046528   ;;  %vm698_vm5 = vcmask 0  }
   0xf   :  { %v175_v19 = vld [vmem:[%s1348_s1 + $0x18] sm:$0xff]  ;;  %v174_v20 = vld [vmem:[%s1348_s1 + $0x10] sm:$0xff]  ;;  %v177_v21 = vld [vmem:[%s1348_s1 + $0x28] sm:$0xff]  ;;  %46 = vst.msk [vmem:[#allocation2 + $0x20] sm:$0xff] %vm41_vm0, %v854_v23 }
  0x10   :  { %v176_v22 = vld [vmem:[%s1348_s1 + $0x20] sm:$0xff]  ;;  %47 = vst.msk [vmem:[#allocation2 + $0x28] sm:$0xff] %vm41_vm0, %v854_v23  ;;  %48 = vst.msk [vmem:[#allocation2 + $0x30] sm:$0xff] %vm41_vm0, %v854_v23  ;;  %v179_v24 = vld [vmem:[%s1348_s1 + $0x38] sm:$0xff] }
  0x11   :  { %49 = vst.msk [vmem:[#allocation2 + $0x38] sm:$0xff] %vm41_vm0, %v854_v23  ;;  %50 = vst.msk [vmem:[#allocation2 + $0x40] sm:$0xff] %vm41_vm0, %v854_v23  ;;  %v178_v25 = vld [vmem:[%s1348_s1 + $0x30] sm:$0xff]  ;;  %v181_v26 = vld [vmem:[%s1348_s1 + $0x48] sm:$0xff] }
  0x12   :  { %331 = vrot.lane.b32.xlu0 %v937_v9, %s852_s16  ;;  %333 = vrot.lane.b32.xlu1 %v942_v10, %s852_s16  ;;  %51 = vst.msk [vmem:[#allocation2 + $0x48] sm:$0xff] %vm41_vm0, %v854_v23  ;;  %52 = vst.msk [vmem:[#allocation2 + $0x50] sm:$0xff] %vm41_vm0, %v854_v23  ;;  %v180_v27 = vld [vmem:[%s1348_s1 + $0x40] sm:$0xff]  ;;  %v183_v28 = vld [vmem:[%s1348_s1 + $0x58] sm:$0xff] }
  0x13   :  { %53 = vst.msk [vmem:[#allocation2 + $0x58] sm:$0xff] %vm41_vm0, %v854_v23  ;;  %54 = vst.msk [vmem:[#allocation2 + $0x60] sm:$0xff] %vm41_vm0, %v854_v23  ;;  %v182_v29 = vld [vmem:[%s1348_s1 + $0x50] sm:$0xff]  ;;  %v184_v30 = vld [vmem:[%s1348_s1 + $0x60] sm:$0xff] }
  0x14   :  { %55 = vst.msk [vmem:[#allocation2 + $0x68] sm:$0xff] %vm41_vm0, %v854_v23  ;;  %56 = vst.msk [vmem:[#allocation2 + $0x70] sm:$0xff] %vm41_vm0, %v854_v23  ;;  %v185_v31 = vld [vmem:[%s1348_s1 + $0x68] sm:$0xff]  ;;  %v186_v32 = vld [vmem:[%s1348_s1 + $0x70] sm:$0xff] }
  0x15   :  { %60 = vst.msk [vmem:[#allocation3] sm:$0xff] %vm59_vm1, %v854_v23  ;;  %61 = vst.msk [vmem:[#allocation3 + $0x8] sm:$0xff] %vm59_vm1, %v854_v23  ;;  %v187_v41 = vld [vmem:[%s1348_s1 + $0x78] sm:$0x7f]  ;;  %s856_s1 = smov [#allocation4]  }
  0x16   :  { %335 = vrot.lane.b32.xlu0 %v951_v11, %s852_s16  ;;  %337 = vrot.lane.b32.xlu1 %v956_v12, %s852_s16  ;;  %62 = vst.msk [vmem:[#allocation3 + $0x10] sm:$0xff] %vm59_vm1, %v854_v23  ;;  %63 = vst.msk [vmem:[#allocation3 + $0x18] sm:$0xff] %vm59_vm1, %v854_v23  ;;  %s764_s24 = sshll.u32 %s856_s1, 4  ;;  %s765_s24 = int_to_ptr.vmem [resolvable:$true] %s764_s24 }
  0x17   :  { %64 = vst.msk [vmem:[#allocation3 + $0x20] sm:$0xff] %vm59_vm1, %v854_v23  ;;  %65 = vst.msk [vmem:[#allocation3 + $0x28] sm:$0xff] %vm59_vm1, %v854_v23  ;;  %s804_s25 = scalar_lea.vmem %s765_s24, 16  ;;  %p809_p1 = scmp.lt.s32.totalorder %s765_s24, %s765_s24 }
  0x18   :  { %66 = vst.msk [vmem:[#allocation3 + $0x30] sm:$0xff] %vm59_vm1, %v854_v23  ;;  %67 = vst.msk [vmem:[#allocation3 + $0x38] sm:$0xff] %vm59_vm1, %v854_v23  ;;  %p805_p0 = scmp.ne.s32.totalorder %s765_s24, %s804_s25 }
  0x19   :  { %68 = vst.msk [vmem:[#allocation3 + $0x40] sm:$0xff] %vm59_vm1, %v854_v23  ;;  %69 = vst.msk [vmem:[#allocation3 + $0x48] sm:$0xff] %vm59_vm1, %v854_v23 }
  0x1a   :  { %339 = vrot.lane.b32.xlu0 %v965_v13, %s852_s16  ;;  %341 = vrot.lane.b32.xlu1 %v970_v14, %s852_s16  ;;  %70 = vst.msk [vmem:[#allocation3 + $0x50] sm:$0xff] %vm59_vm1, %v854_v23  ;;  %71 = vst.msk [vmem:[#allocation3 + $0x58] sm:$0xff] %vm59_vm1, %v854_v23 }
  0x1b   :  { %72 = vst.msk [vmem:[#allocation3 + $0x60] sm:$0xff] %vm59_vm1, %v854_v23  ;;  %73 = vst.msk [vmem:[#allocation3 + $0x68] sm:$0xff] %vm59_vm1, %v854_v23 }
  0x1c   :  { %74 = vst.msk [vmem:[#allocation3 + $0x70] sm:$0xff] %vm59_vm1, %v854_v23  ;;  %75 = vst.msk [vmem:[#allocation3 + $0x78] sm:$0xff] %vm59_vm1, %v854_v23 }
  0x1d   :  { %58 = vst.msk [vmem:[#allocation2 + $0x78] sm:$0x7f] %vm57_vm2, %v854_v23 }
  0x1e   :  { %343 = vrot.lane.b32.xlu0 %v979_v15, %s852_s16  ;;  %345 = vrot.lane.b32.xlu1 %v984_v16, %s852_s16  ;;  %s808_s16 = scalar_lea.vmem %s765_s24, 32 }
  0x1f   :  { %p810_p2 = scmp.lt.s32.totalorder %s808_s16, %s804_s25 }
  0x21   :  { %p811_p3 = por %p810_p2, %p809_p1 }
  0x22   :  { %190 = vperm.xlu0 %802, %v172_v17   ;;  %194 = vperm.xlu1 %803, %v173_v18  }
  0x23   :  { %p812_p4 = pnand %p811_p3, %p805_p0 }
  0x26   :  { %202 = vperm.xlu0 %802, %v175_v19   ;;  %198 = vperm.xlu1 %803, %v174_v20  }
  0x2a   :  { %210 = vperm.xlu0 %802, %v177_v21   ;;  %206 = vperm.xlu1 %803, %v176_v22  }
  0x2e   :  { %218 = vperm.xlu0 %802, %v179_v24   ;;  %214 = vperm.xlu1 %803, %v178_v25  }
  0x32   :  { %226 = vperm.xlu0 %802, %v181_v26   ;;  %222 = vperm.xlu1 %803, %v180_v27  }
  0x36   :  { %234 = vperm.xlu0 %802, %v183_v28   ;;  %230 = vperm.xlu1 %803, %v182_v29  }
  0x3a   :  { %238 = vperm.xlu0 %802, %v184_v30  }
  0x3e   :  { %242 = vperm.xlu0 %802, %v185_v31  }
  0x42   :  { %246 = vperm.xlu0 %802, %v186_v32  }
  0x74   :  { %v316_v33 = vpop.permute.xlu0 %315  ;;  %v320_v34 = vpop.permute.xlu1 %319 }
  0x75   :  { %v363_v35 = vsub.f32 %v881_v0, %v316_v33  ;;  %v365_v40 = vsub.f32 %v886_v1, %v320_v34  ;;  %v110_v33 = vrot.slane %v895_v2, 7  ;;  %v109_v34 = vrot.slane %v881_v0, 7 }
  0x77   :  { %v525_v36 = vmul.f32 %v363_v35, %v363_v35  ;;  %v527_v45 = vmul.f32 %v365_v40, %v365_v40  ;;  %v112_v35 = vrot.slane %v886_v1, 7  ;;  %v111_v40 = vsel %vm108_vm3, %v109_v34, %v110_v33 }
  0x78   :  { %v318_v37 = vpop.permute.xlu0 %317  ;;  %v322_v38 = vpop.permute.xlu1 %321 }
  0x79   :  { %v364_v39 = vsub.f32 %v895_v2, %v318_v37  ;;  %557 = vrot.lane.b32.xlu0 %v525_v36, %s855_s21  ;;  %v366_v46 = vsub.f32 %v900_v3, %v322_v38  ;;  %v114_v36 = vrot.slane %v900_v3, 7  ;;  %v116_v38 = vrot.slane %v909_v5, 7 }
  0x7b   :  { %v526_v42 = vmul.f32 %v364_v39, %v364_v39  ;;  %v528_v49 = vmul.f32 %v366_v46, %v366_v46  ;;  %v118_v39 = vrot.slane %v914_v6, 7  ;;  %v124_v46 = vrot.slane %v937_v9, 7 }
  0x7c   :  { %v324_v43 = vpop.permute.xlu0 %323  ;;  %v326_v44 = vpop.permute.xlu1 %325 }
  0x7d   :  { %250 = vperm.xlu0 %802, %v187_v41   ;;  %559 = vrot.lane.b32.xlu1 %v526_v42, %s855_s21  ;;  %v367_v50 = vsub.f32 %v909_v5, %v324_v43  ;;  %v368_v56 = vsub.f32 %v914_v6, %v326_v44  ;;  %v120_v41 = vrot.slane %v923_v7, 7  ;;  %v113_v42 = vsel %vm108_vm3, %v110_v33, %v112_v35 }
  0x7e   :  { %v122_v43 = vrot.slane %v928_v8, 7  ;;  %v156_v44 = vsub.f32 %v881_v0, %v109_v34 }
  0x7f   :  { %v529_v55 = vmul.f32 %v367_v50, %v367_v50  ;;  %v530_v60 = vmul.f32 %v368_v56, %v368_v56  ;;  %v117_v50 = vsel %vm108_vm3, %v114_v36, %v116_v38  ;;  %v1152_v0 = vsel %vm108_vm3, %v118_v39, %v120_v41 }
  0x80   :  { %v328_v47 = vpop.permute.xlu0 %327  ;;  %v330_v48 = vpop.permute.xlu1 %329 }
  0x81   :  { %561 = vrot.lane.b32.xlu1 %v527_v45, %s855_s21  ;;  %v370_v51 = vsub.f32 %v928_v8, %v330_v48  ;;  %v369_v61 = vsub.f32 %v923_v7, %v328_v47  ;;  %v115_v45 = vsel %vm108_vm3, %v112_v35, %v114_v36 }
  0x82   :  { %v159_v56 = vsub.f32 %v900_v3, %v115_v45 }
  0x83   :  { %v532_v52 = vmul.f32 %v370_v51, %v370_v51  ;;  %v531_v18 = vmul.f32 %v369_v61, %v369_v61  ;;  %v119_v51 = vsel %vm108_vm3, %v116_v38, %v118_v39  ;;  %v1163_v61 = vsel %vm108_vm3, %v122_v43, %v124_v46 }
  0x84   :  { %v332_v53 = vpop.permute.xlu0 %331  ;;  %v334_v54 = vpop.permute.xlu1 %333 }
  0x85   :  { %563 = vrot.lane.b32.xlu1 %v528_v49, %s855_s21  ;;  %v372_v57 = vsub.f32 %v942_v10, %v334_v54  ;;  %571 = vrot.lane.b32.xlu0 %v532_v52, %s855_s21  ;;  %v371_v19 = vsub.f32 %v937_v9, %v332_v53  ;;  %v157_v49 = vsub.f32 %v895_v2, %v111_v40 }
  0x86   :  { %v158_v54 = vsub.f32 %v886_v1, %v113_v42  ;;  %v381_v42 = vld [vmem:[#allocation2 + $0x10] sm:$0xff] }
  0x87   :  { %v534_v58 = vmul.f32 %v372_v57, %v372_v57  ;;  %v533_v24 = vmul.f32 %v371_v19, %v371_v19  ;;  %v1157_v57 = vsel %vm108_vm3, %v120_v41, %v122_v43  ;;  %v380_v41 = vld [vmem:[#allocation2 + $0x8] sm:$0xff] }
  0x88   :  { %v338_v59 = vpop.permute.xlu1 %337  ;;  %v336_v63 = vpop.permute.xlu0 %335  ;;  %v163_v19 = vsub.f32 %v928_v8, %v1157_v57 }
  0x89   :  { %565 = vrot.lane.b32.xlu1 %v529_v55, %s855_s21  ;;  %v374_v62 = vsub.f32 %v956_v12, %v338_v59  ;;  %575 = vrot.lane.b32.xlu0 %v534_v58, %s855_s21  ;;  %v373_v25 = vsub.f32 %v951_v11, %v336_v63  ;;  %v126_v55 = vrot.slane %v942_v10, 7  ;;  %v160_v59 = vsub.f32 %v909_v5, %v117_v50 }
  0x8a   :  { %v128_v5 = vrot.slane %v951_v11, 7 }
  0x8b   :  { %v536_v4 = vmul.f32 %v374_v62, %v374_v62  ;;  %v535_v28 = vmul.f32 %v373_v25, %v373_v25 }
  0x8c   :  { %v342_v17 = vpop.permute.xlu1 %341  ;;  %v340_v22 = vpop.permute.xlu0 %339 }
  0x8d   :  { %567 = vrot.lane.b32.xlu1 %v530_v60, %s855_s21  ;;  %v376_v20 = vsub.f32 %v970_v14, %v342_v17  ;;  %579 = vrot.lane.b32.xlu0 %v536_v4, %s855_s21  ;;  %v375_v29 = vsub.f32 %v965_v13, %v340_v22  ;;  %v161_v60 = vsub.f32 %v914_v6, %v119_v51 }
  0x8e   :  { %v162_v4 = vsub.f32 %v923_v7, %v1152_v0  ;;  %v164_v7 = vsub.f32 %v937_v9, %v1163_v61 }
  0x8f   :  { %v538_v21 = vmul.f32 %v376_v20, %v376_v20  ;;  %v537_v31 = vmul.f32 %v375_v29, %v375_v29  ;;  %v1170_v20 = vsel %vm108_vm3, %v124_v46, %v126_v55  ;;  %v130_v29 = vrot.slane %v956_v12, 7 }
  0x90   :  { %v346_v23 = vpop.permute.xlu1 %345  ;;  %v344_v30 = vpop.permute.xlu0 %343  ;;  %v165_v33 = vsub.f32 %v942_v10, %v1170_v20 }
  0x91   :  { %569 = vrot.lane.b32.xlu1 %v531_v18, %s855_s21  ;;  %v378_v26 = vsub.f32 %v984_v16, %v346_v23  ;;  %583 = vrot.lane.b32.xlu0 %v538_v21, %s855_s21  ;;  %v377_v32 = vsub.f32 %v979_v15, %v344_v30  ;;  %v132_v30 = vrot.slane %v965_v13, 7 }
  0x93   :  { %v540_v27 = vmul.f32 %v378_v26, %v378_v26  ;;  %v539_v37 = vmul.f32 %v377_v32, %v377_v32 }
  0x95   :  { %573 = vrot.lane.b32.xlu1 %v533_v24, %s855_s21  ;;  %587 = vrot.lane.b32.xlu0 %v540_v27, %s855_s21  ;;  %v379_v24 = vld [vmem:[#allocation2] sm:$0xff] }
  0x99   :  { %577 = vrot.lane.b32.xlu1 %v535_v28, %s855_s21 }
  0x9d   :  { %581 = vrot.lane.b32.xlu1 %v537_v31, %s855_s21 }
  0xa1   :  { %585 = vrot.lane.b32.xlu1 %v539_v37, %s855_s21  ;;  %v191_v47 = vpop.permute.xlu0 %190  ;;  %v195_v48 = vpop.permute.xlu1 %194  ;;  %v1183_v37 = vsel %vm108_vm3, %v126_v55, %v128_v5 }
  0xa2   :  { %v252_v52 = vrot.slane %v191_v47, 7  ;;  %v253_v53 = vrot.slane %v195_v48, 7  ;;  %v1188_v48 = vsel %vm108_vm3, %v128_v5, %v130_v29 }
  0xa3   :  { %v167_v20 = vsub.f32 %v956_v12, %v1188_v48  ;;  %v385_v12 = vld [vmem:[#allocation2 + $0x30] sm:$0xff] }
  0xa4   :  { %v299_v58 = vmul.f32 %v252_v52, %v156_v44  ;;  %v254_v2 = vsel %vm108_vm3, %v252_v52, %v253_v53 }
  0xa5   :  { %v300_v1 = vmul.f32 %v254_v2, %v157_v49  ;;  %v203_v62 = vpop.permute.xlu0 %202  ;;  %v199_v63 = vpop.permute.xlu1 %198  ;;  %v1193_v49 = vsel %vm108_vm3, %v130_v29, %v132_v30  ;;  %v382_v2 = vld [vmem:[#allocation2 + $0x18] sm:$0xff] }
  0xa6   :  { %v395_v3 = vmul.f32 %v299_v58, %v299_v58  ;;  %v257_v17 = vrot.slane %v203_v62, 7  ;;  %v255_v18 = vrot.slane %v199_v63, 7 }
  0xa7   :  { %v396_v6 = vmul.f32 %v300_v1, %v300_v1 }
  0xa8   :  { %v428_v21 = vrot.slane %v395_v3, 1  ;;  %v256_v22 = vsel %vm108_vm3, %v253_v53, %v255_v18  ;;  %v258_v23 = vsel %vm108_vm3, %v255_v18, %v257_v17  ;;  %v166_v18 = vsub.f32 %v951_v11, %v1183_v37 }
  0xa9   :  { %v429_v25 = vrot.slane %v396_v6, 1  ;;  %v301_v26 = vmul.f32 %v256_v22, %v158_v54  ;;  %v302_v27 = vmul.f32 %v258_v23, %v159_v56  ;;  %v211_v8 = vpop.permute.xlu0 %210  ;;  %v207_v28 = vpop.permute.xlu1 %206 }
  0xaa   :  { %v261_v31 = vrot.slane %v211_v8, 7  ;;  %v259_v32 = vrot.slane %v207_v28, 7 }
  0xab   :  { %v430_v34 = vsel %vm427_vm4, %v428_v21, %v429_v25  ;;  %v397_v35 = vmul.f32 %v301_v26, %v301_v26  ;;  %v398_v36 = vmul.f32 %v302_v27, %v302_v27  ;;  %v384_v26 = vld [vmem:[#allocation2 + $0x28] sm:$0xff] }
  0xac   :  { %v475_v38 = vadd.f32 %v430_v34, %v379_v24  ;;  %v260_v39 = vsel %vm108_vm3, %v257_v17, %v259_v32  ;;  %v262_v40 = vsel %vm108_vm3, %v259_v32, %v261_v31  ;;  %v168_v34 = vsub.f32 %v965_v13, %v1193_v49 }
  0xad   :  { %v431_v43 = vrot.slane %v397_v35, 1  ;;  %v433_v44 = vrot.slane %v398_v36, 1  ;;  %v303_v45 = vmul.f32 %v260_v39, %v160_v59  ;;  %v304_v46 = vmul.f32 %v262_v40, %v161_v60  ;;  %v219_v47 = vpop.permute.xlu0 %218  ;;  %v215_v10 = vpop.permute.xlu1 %214  ;;  %v383_v59 = vld [vmem:[#allocation2 + $0x20] sm:$0xff] }
  0xae   :  { %492 = vst.msk [vmem:[#allocation2] sm:$0xff] %vm41_vm0, %v475_v38  ;;  %v265_v50 = vrot.slane %v219_v47, 7  ;;  %v263_v51 = vrot.slane %v215_v10, 7  ;;  %v134_v35 = vrot.slane %v970_v14, 7  ;;  %v136_v49 = vrot.slane %v979_v15, 7 }
  0xaf   :  { %v432_v52 = vsel %vm427_vm4, %v429_v25, %v431_v43  ;;  %v434_v53 = vsel %vm427_vm4, %v431_v43, %v433_v44  ;;  %v399_v54 = vmul.f32 %v303_v45, %v303_v45  ;;  %v400_v0 = vmul.f32 %v304_v46, %v304_v46  ;;  %v387_v43 = vld [vmem:[#allocation2 + $0x40] sm:$0xff] }
  0xb0   :  { %v476_v55 = vadd.f32 %v432_v52, %v380_v41  ;;  %v477_v56 = vadd.f32 %v434_v53, %v381_v42  ;;  %v264_v57 = vsel %vm108_vm3, %v261_v31, %v263_v51  ;;  %v266_v58 = vsel %vm108_vm3, %v263_v51, %v265_v50  ;;  %v386_v42 = vld [vmem:[#allocation2 + $0x38] sm:$0xff] }
  0xb1   :  { %v435_v60 = vrot.slane %v399_v54, 1  ;;  %v437_v1 = vrot.slane %v400_v0, 1  ;;  %v305_v62 = vmul.f32 %v264_v57, %v162_v4  ;;  %v306_v63 = vmul.f32 %v266_v58, %v163_v19  ;;  %v227_v3 = vpop.permute.xlu0 %226  ;;  %v223_v17 = vpop.permute.xlu1 %222  ;;  %v389_v57 = vld [vmem:[#allocation2 + $0x50] sm:$0xff] }
  0xb2   :  { %493 = vst.msk [vmem:[#allocation2 + $0x8] sm:$0xff] %vm41_vm0, %v476_v55  ;;  %494 = vst.msk [vmem:[#allocation2 + $0x10] sm:$0xff] %vm41_vm0, %v477_v56  ;;  %v269_v5 = vrot.slane %v227_v3, 7  ;;  %v267_v6 = vrot.slane %v223_v17, 7  ;;  %v135_v48 = vsel %vm108_vm3, %v132_v30, %v134_v35  ;;  %v388_v30 = vld [vmem:[#allocation2 + $0x48] sm:$0xff] }
  0xb3   :  { %v436_v21 = vsel %vm427_vm4, %v433_v44, %v435_v60  ;;  %v438_v22 = vsel %vm427_vm4, %v435_v60, %v437_v1  ;;  %v401_v4 = vmul.f32 %v305_v62, %v305_v62  ;;  %v402_v19 = vmul.f32 %v306_v63, %v306_v63 }
  0xb4   :  { %v478_v23 = vadd.f32 %v436_v21, %v382_v2  ;;  %v479_v24 = vadd.f32 %v438_v22, %v383_v59  ;;  %v268_v25 = vsel %vm108_vm3, %v265_v50, %v267_v6  ;;  %v270_v11 = vsel %vm108_vm3, %v267_v6, %v269_v5  ;;  %v390_v6 = vld [vmem:[#allocation2 + $0x58] sm:$0xff] }
  0xb5   :  { %v439_v27 = vrot.slane %v401_v4, 1  ;;  %v441_v8 = vrot.slane %v402_v19, 1  ;;  %v307_v28 = vmul.f32 %v268_v25, %v164_v7  ;;  %v308_v29 = vmul.f32 %v270_v11, %v165_v33  ;;  %v235_v31 = vpop.permute.xlu0 %234  ;;  %v231_v32 = vpop.permute.xlu1 %230 }
  0xb6   :  { %495 = vst.msk [vmem:[#allocation2 + $0x18] sm:$0xff] %vm41_vm0, %v478_v23  ;;  %496 = vst.msk [vmem:[#allocation2 + $0x20] sm:$0xff] %vm41_vm0, %v479_v24  ;;  %v273_v36 = vrot.slane %v235_v31, 7  ;;  %v271_v37 = vrot.slane %v231_v32, 7  ;;  %v169_v13 = vsub.f32 %v970_v14, %v135_v48  ;;  %v392_v31 = vld [vmem:[#allocation2 + $0x68] sm:$0xff] }
  0xb7   :  { %v440_v38 = vsel %vm427_vm4, %v437_v1, %v439_v27  ;;  %v442_v39 = vsel %vm427_vm4, %v439_v27, %v441_v8  ;;  %v403_v9 = vmul.f32 %v307_v28, %v307_v28  ;;  %v404_v61 = vmul.f32 %v308_v29, %v308_v29 }
  0xb8   :  { %v480_v7 = vadd.f32 %v440_v38, %v384_v26  ;;  %v481_v33 = vadd.f32 %v442_v39, %v385_v12  ;;  %v272_v40 = vsel %vm108_vm3, %v269_v5, %v271_v37  ;;  %v274_v41 = vsel %vm108_vm3, %v271_v37, %v273_v36  ;;  %v391_v26 = vld [vmem:[#allocation2 + $0x60] sm:$0xff] }
  0xb9   :  { %v443_v44 = vrot.slane %v403_v9, 1  ;;  %v445_v45 = vrot.slane %v404_v61, 1  ;;  %v309_v46 = vmul.f32 %v272_v40, %v166_v18  ;;  %v310_v47 = vmul.f32 %v274_v41, %v167_v20  ;;  %v239_v10 = vpop.permute.xlu0 %238  ;;  %v642_v37 = vld [vmem:[#allocation2 + $0x8] sm:$0xff]  ;;  %v643_v9 = vld [vmem:[#allocation2 + $0x10] sm:$0xff] }
  0xba   :  { %497 = vst.msk [vmem:[#allocation2 + $0x28] sm:$0xff] %vm41_vm0, %v480_v7  ;;  %498 = vst.msk [vmem:[#allocation2 + $0x30] sm:$0xff] %vm41_vm0, %v481_v33  ;;  %v275_v50 = vrot.slane %v239_v10, 7  ;;  %v137_v1 = vsel %vm108_vm3, %v134_v35, %v136_v49  ;;  %v658_v39 = vsel %vm41_vm0, %v642_v37, 0.0  ;;  %v660_v7 = vsel %vm41_vm0, %v643_v9, 0.0  ;;  %v518_v9 = vld [vmem:[#allocation3 + $0x48] sm:$0xff] }
  0xbb   :  { %v444_v51 = vsel %vm427_vm4, %v441_v8, %v443_v44  ;;  %v446_v52 = vsel %vm427_vm4, %v443_v44, %v445_v45  ;;  %v405_v53 = vmul.f32 %v309_v46, %v309_v46  ;;  %v406_v54 = vmul.f32 %v310_v47, %v310_v47 }
  0xbc   :  { %v482_v0 = vadd.f32 %v444_v51, %v386_v42  ;;  %v483_v55 = vadd.f32 %v446_v52, %v387_v43  ;;  %v276_v56 = vsel %vm108_vm3, %v273_v36, %v275_v50  ;;  %v170_v5 = vsub.f32 %v979_v15, %v137_v1  ;;  %v641_v36 = vld [vmem:[#allocation2] sm:$0xff]  ;;  %v510_v51 = vld [vmem:[#allocation3 + $0x8] sm:$0xff]  ;;  %v516_v15 = vld [vmem:[#allocation3 + $0x38] sm:$0xff] }
  0xbd   :  { %v447_v58 = vrot.slane %v405_v53, 1  ;;  %v449_v2 = vrot.slane %v406_v54, 1  ;;  %v311_v59 = vmul.f32 %v276_v56, %v168_v34  ;;  %v243_v60 = vpop.permute.xlu0 %242  ;;  %v657_v38 = vsel %vm41_vm0, %v641_v36, 0.0  ;;  %v644_v33 = vld [vmem:[#allocation2 + $0x18] sm:$0xff]  ;;  %v645_v42 = vld [vmem:[#allocation2 + $0x20] sm:$0xff]  ;;  %v511_v56 = vld [vmem:[#allocation3 + $0x10] sm:$0xff] }
  0xbe   :  { %499 = vst.msk [vmem:[#allocation2 + $0x38] sm:$0xff] %vm41_vm0, %v482_v0  ;;  %500 = vst.msk [vmem:[#allocation2 + $0x40] sm:$0xff] %vm41_vm0, %v483_v55  ;;  %v277_v62 = vrot.slane %v243_v60, 7  ;;  %v659_v61 = vadd.f32 %v658_v39, %v657_v38  ;;  %v662_v41 = vsel %vm41_vm0, %v644_v33, 0.0  ;;  %v664_v44 = vsel %vm41_vm0, %v645_v42, 0.0  ;;  %v512_v60 = vld [vmem:[#allocation3 + $0x18] sm:$0xff] }
  0xbf   :  { %v448_v63 = vsel %vm427_vm4, %v445_v45, %v447_v58  ;;  %v450_v3 = vsel %vm427_vm4, %v447_v58, %v449_v2  ;;  %v407_v14 = vmul.f32 %v311_v59, %v311_v59  ;;  %v509_v45 = vld [vmem:[#allocation3] sm:$0xff]  ;;  %v138_v59 = vrot.slane %v984_v16, 7 }
  0xc0   :  { %v484_v17 = vadd.f32 %v448_v63, %v388_v30  ;;  %v485_v18 = vadd.f32 %v450_v3, %v389_v57  ;;  %v278_v20 = vsel %vm108_vm3, %v275_v50, %v277_v62  ;;  %v661_v40 = vadd.f32 %v660_v7, %v659_v61  ;;  %v394_v7 = vld [vmem:[#allocation2 + $0x78] sm:$0x7f] }
  0xc1   :  { %v451_v21 = vrot.slane %v407_v14, 1  ;;  %v312_v22 = vmul.f32 %v278_v20, %v169_v13  ;;  %v1241_v4 = vpop.permute.xlu0 %246  ;;  %v646_v46 = vld [vmem:[#allocation2 + $0x28] sm:$0xff]  ;;  %v647_v52 = vld [vmem:[#allocation2 + $0x30] sm:$0xff] }
  0xc2   :  { %501 = vst.msk [vmem:[#allocation2 + $0x48] sm:$0xff] %vm41_vm0, %v484_v17  ;;  %502 = vst.msk [vmem:[#allocation2 + $0x50] sm:$0xff] %vm41_vm0, %v485_v18  ;;  %v279_v19 = vrot.slane %v1241_v4, 7  ;;  %v663_v43 = vadd.f32 %v662_v41, %v661_v40  ;;  %v666_v50 = vsel %vm41_vm0, %v646_v46, 0.0  ;;  %v668_v55 = vsel %vm41_vm0, %v647_v52, 0.0  ;;  %v513_v18 = vld [vmem:[#allocation3 + $0x20] sm:$0xff] }
  0xc3   :  { %v452_v23 = vsel %vm427_vm4, %v449_v2, %v451_v21  ;;  %v408_v24 = vmul.f32 %v312_v22, %v312_v22  ;;  %v139_v17 = vsel %vm108_vm3, %v136_v49, %v138_v59  ;;  %v393_v41 = vld [vmem:[#allocation2 + $0x70] sm:$0xff] }
  0xc4   :  { %v486_v25 = vadd.f32 %v452_v23, %v390_v6  ;;  %v280_v11 = vsel %vm108_vm3, %v277_v62, %v279_v19  ;;  %v665_v10 = vadd.f32 %v664_v44, %v663_v43 }
  0xc5   :  { %v453_v12 = vrot.slane %v408_v24, 1  ;;  %v313_v27 = vmul.f32 %v280_v11, %v170_v5  ;;  %v648_v13 = vld [vmem:[#allocation2 + $0x38] sm:$0xff]  ;;  %v649_v1 = vld [vmem:[#allocation2 + $0x40] sm:$0xff]  ;;  %v514_v11 = vld [vmem:[#allocation3 + $0x28] sm:$0xff] }
  0xc6   :  { %503 = vst.msk [vmem:[#allocation2 + $0x58] sm:$0xff] %vm41_vm0, %v486_v25  ;;  %v667_v54 = vadd.f32 %v666_v50, %v665_v10  ;;  %v670_v2 = vsel %vm41_vm0, %v648_v13, 0.0  ;;  %v672_v14 = vsel %vm41_vm0, %v649_v1, 0.0 }
  0xc7   :  { %v454_v8 = vsel %vm427_vm4, %v451_v21, %v453_v12  ;;  %v1252_v28 = vmul.f32 %v313_v27, %v313_v27  ;;  %v171_v21 = vsub.f32 %v984_v16, %v139_v17 }
  0xc8   :  { %v487_v29 = vadd.f32 %v454_v8, %v391_v26  ;;  %v669_v57 = vadd.f32 %v668_v55, %v667_v54 }
  0xc9   :  { %v455_v32 = vrot.slane %v1252_v28, 1  ;;  %v650_v20 = vld [vmem:[#allocation2 + $0x48] sm:$0xff]  ;;  %v651_v26 = vld [vmem:[#allocation2 + $0x50] sm:$0xff] }
  0xca   :  { %504 = vst.msk [vmem:[#allocation2 + $0x60] sm:$0xff] %vm41_vm0, %v487_v29  ;;  %v671_v63 = vadd.f32 %v670_v2, %v669_v57  ;;  %v674_v24 = vsel %vm41_vm0, %v650_v20, 0.0 }
  0xcb   :  { %v456_v34 = vsel %vm427_vm4, %v453_v12, %v455_v32 }
  0xcc   :  { %v488_v35 = vadd.f32 %v456_v34, %v392_v31  ;;  %v673_v6 = vadd.f32 %v672_v14, %v671_v63  ;;  %v676_v34 = vsel %vm41_vm0, %v651_v26, 0.0  ;;  %v522_v63 = vld [vmem:[#allocation3 + $0x68] sm:$0xff]  ;;  %v524_v26 = vld [vmem:[#allocation3 + $0x78] sm:$0xff] }
  0xcd   :  { %v652_v61 = vld [vmem:[#allocation2 + $0x58] sm:$0xff] }
  0xce   :  { %505 = vst.msk [vmem:[#allocation2 + $0x68] sm:$0xff] %vm41_vm0, %v488_v35  ;;  %v675_v27 = vadd.f32 %v674_v24, %v673_v6  ;;  %v515_v35 = vld [vmem:[#allocation3 + $0x30] sm:$0xff] }
  0xd0   :  { %v677_v33 = vadd.f32 %v676_v34, %v675_v27 }
  0xeb   :  { %v558_v47 = vpop.permute.xlu0 %557 }
  0xec   :  { %v605_v48 = vadd.f32 %v558_v47, %v509_v45  ;;  %v517_v47 = vld [vmem:[#allocation3 + $0x40] sm:$0xff] }
  0xee   :  { %622 = vst.msk [vmem:[#allocation3] sm:$0xff] %vm59_vm1, %v605_v48  ;;  %v678_v48 = vsel %vm41_vm0, %v652_v61, 0.0 }
  0xef   :  { %v560_v53 = vpop.permute.xlu1 %559  ;;  %v679_v2 = vadd.f32 %v678_v48, %v677_v33 }
  0xf0   :  { %v606_v0 = vadd.f32 %v560_v53, %v510_v51  ;;  %v520_v53 = vld [vmem:[#allocation3 + $0x58] sm:$0xff] }
  0xf2   :  { %623 = vst.msk [vmem:[#allocation3 + $0x8] sm:$0xff] %vm59_vm1, %v606_v0  ;;  %v653_v0 = vld [vmem:[#allocation2 + $0x60] sm:$0xff] }
  0xf3   :  { %v562_v30 = vpop.permute.xlu1 %561 }
  0xf4   :  { %v607_v58 = vadd.f32 %v562_v30, %v511_v56 }
  0xf5   :  { %v700_v37 = vld [vmem:[#allocation3] sm:$0xff] }
  0xf6   :  { %624 = vst.msk [vmem:[#allocation3 + $0x10] sm:$0xff] %vm59_vm1, %v607_v58  ;;  %v716_v45 = vsel %vm59_vm1, %v700_v37, 0.0 }
  0xf7   :  { %v564_v62 = vpop.permute.xlu1 %563 }
  0xf8   :  { %v608_v3 = vadd.f32 %v564_v62, %v512_v60  ;;  %v680_v60 = vsel %vm41_vm0, %v653_v0, 0.0 }
  0xf9   :  { %v701_v8 = vld [vmem:[#allocation3 + $0x8] sm:$0xff] }
  0xfa   :  { %625 = vst.msk [vmem:[#allocation3 + $0x18] sm:$0xff] %vm59_vm1, %v608_v3  ;;  %v717_v4 = vsel %vm59_vm1, %v701_v8, 0.0  ;;  %v654_v3 = vld [vmem:[#allocation2 + $0x68] sm:$0xff] }
  0xfb   :  { %v566_v5 = vpop.permute.xlu1 %565  ;;  %v718_v51 = vadd.f32 %v717_v4, %v716_v45  ;;  %v682_v24 = vsel %vm41_vm0, %v654_v3, 0.0 }
  0xfc   :  { %v609_v22 = vadd.f32 %v566_v5, %v513_v18  ;;  %v251_v23 = vpop.permute.xlu0 %250 }
  0xfd   :  { %v281_v25 = vrot.slane %v251_v23, 7  ;;  %v702_v38 = vld [vmem:[#allocation3 + $0x10] sm:$0xff] }
  0xfe   :  { %626 = vst.msk [vmem:[#allocation3 + $0x20] sm:$0xff] %vm59_vm1, %v609_v22  ;;  %v719_v46 = vsel %vm59_vm1, %v702_v38, 0.0  ;;  %v521_v22 = vld [vmem:[#allocation3 + $0x60] sm:$0xff] }
  0xff   :  { %v282_v49 = vsel %vm108_vm3, %v279_v19, %v281_v25  ;;  %v568_v12 = vpop.permute.xlu1 %567  ;;  %v720_v30 = vadd.f32 %v719_v46, %v718_v51 }
 0x100   :  { %v314_v29 = vmul.f32 %v282_v49, %v171_v21  ;;  %v610_v31 = vadd.f32 %v568_v12, %v514_v11  ;;  %v572_v16 = vpop.permute.xlu0 %571  ;;  %v681_v21 = vadd.f32 %v680_v60, %v679_v2 }
 0x101   :  { %v612_v36 = vadd.f32 %v572_v16, %v516_v15  ;;  %v703_v40 = vld [vmem:[#allocation3 + $0x18] sm:$0xff] }
 0x102   :  { %v410_v39 = vmul.f32 %v314_v29, %v314_v29  ;;  %627 = vst.msk [vmem:[#allocation3 + $0x28] sm:$0xff] %vm59_vm1, %v610_v31  ;;  %v721_v55 = vsel %vm59_vm1, %v703_v40, 0.0 }
 0x103   :  { %v570_v19 = vpop.permute.xlu1 %569  ;;  %629 = vst.msk [vmem:[#allocation3 + $0x38] sm:$0xff] %vm59_vm1, %v612_v36  ;;  %v722_v62 = vadd.f32 %v721_v55, %v720_v30  ;;  %v523_v36 = vld [vmem:[#allocation3 + $0x70] sm:$0xff] }
 0x104   :  { %v457_v42 = vrot.slane %v410_v39, 1  ;;  %v611_v43 = vadd.f32 %v570_v19, %v515_v35  ;;  %v576_v44 = vpop.permute.xlu0 %575  ;;  %v683_v35 = vadd.f32 %v682_v24, %v681_v21 }
 0x105   :  { %v614_v10 = vadd.f32 %v576_v44, %v518_v9  ;;  %v704_v50 = vld [vmem:[#allocation3 + $0x20] sm:$0xff] }
 0x106   :  { %v458_v52 = vsel %vm427_vm4, %v455_v32, %v457_v42  ;;  %628 = vst.msk [vmem:[#allocation3 + $0x30] sm:$0xff] %vm59_vm1, %v611_v43  ;;  %v490_v54 = vadd.f32 %v457_v42, %v394_v7  ;;  %v723_v28 = vsel %vm59_vm1, %v704_v50, 0.0  ;;  %v519_v32 = vld [vmem:[#allocation3 + $0x50] sm:$0xff] }
 0x107   :  { %v489_v56 = vadd.f32 %v458_v52, %v393_v41  ;;  %v574_v13 = vpop.permute.xlu1 %573  ;;  %631 = vst.msk [vmem:[#allocation3 + $0x48] sm:$0xff] %vm59_vm1, %v614_v10  ;;  %v724_v20 = vadd.f32 %v723_v28, %v722_v62 }
 0x108   :  { %v613_v57 = vadd.f32 %v574_v13, %v517_v47  ;;  %v580_v58 = vpop.permute.xlu0 %579  ;;  %508 = vst.msk [vmem:[#allocation2 + $0x78] sm:$0x7f] %vm57_vm2, %v490_v54 }
 0x109   :  { %506 = vst.msk [vmem:[#allocation2 + $0x70] sm:$0xff] %vm41_vm0, %v489_v56  ;;  %v616_v59 = vadd.f32 %v580_v58, %v520_v53  ;;  %v705_v1 = vld [vmem:[#allocation3 + $0x28] sm:$0xff] }
 0x10a   :  { %630 = vst.msk [vmem:[#allocation3 + $0x40] sm:$0xff] %vm59_vm1, %v613_v57  ;;  %v725_v14 = vsel %vm59_vm1, %v705_v1, 0.0  ;;  %v707_v18 = vld [vmem:[#allocation3 + $0x38] sm:$0xff] }
 0x10b   :  { %v578_v17 = vpop.permute.xlu1 %577  ;;  %633 = vst.msk [vmem:[#allocation3 + $0x58] sm:$0xff] %vm59_vm1, %v616_v59  ;;  %v726_v11 = vadd.f32 %v725_v14, %v724_v20  ;;  %v729_v49 = vsel %vm59_vm1, %v707_v18, 0.0 }
 0x10c   :  { %v615_v5 = vadd.f32 %v578_v17, %v519_v32  ;;  %v584_v6 = vpop.permute.xlu0 %583 }
 0x10d   :  { %v618_v23 = vadd.f32 %v584_v6, %v522_v63  ;;  %v706_v25 = vld [vmem:[#allocation3 + $0x30] sm:$0xff] }
 0x10e   :  { %632 = vst.msk [vmem:[#allocation3 + $0x50] sm:$0xff] %vm59_vm1, %v615_v5  ;;  %v727_v15 = vsel %vm59_vm1, %v706_v25, 0.0  ;;  %v709_v27 = vld [vmem:[#allocation3 + $0x48] sm:$0xff] }
 0x10f   :  { %v582_v12 = vpop.permute.xlu1 %581  ;;  %635 = vst.msk [vmem:[#allocation3 + $0x68] sm:$0xff] %vm59_vm1, %v618_v23  ;;  %v728_v8 = vadd.f32 %v727_v15, %v726_v11  ;;  %v656_v34 = vld [vmem:[#allocation2 + $0x78] sm:$0x7f]  ;;  %v733_v19 = vsel %vm59_vm1, %v709_v27, 0.0 }
 0x110   :  { %v617_v29 = vadd.f32 %v582_v12, %v521_v22  ;;  %v588_v31 = vpop.permute.xlu0 %587  ;;  %v655_v16 = vld [vmem:[#allocation2 + $0x70] sm:$0xff]  ;;  %v686_v33 = vsel %vm57_vm2, %v656_v34, 0.0 }
 0x111   :  { %v620_v37 = vadd.f32 %v588_v31, %v524_v26  ;;  %v684_v38 = vsel %vm41_vm0, %v655_v16, 0.0  ;;  %v708_v39 = vld [vmem:[#allocation3 + $0x40] sm:$0xff]  ;;  %v730_v9 = vadd.f32 %v729_v49, %v728_v8 }
 0x112   :  { %634 = vst.msk [vmem:[#allocation3 + $0x60] sm:$0xff] %vm59_vm1, %v617_v29  ;;  %v685_v61 = vadd.f32 %v684_v38, %v683_v35  ;;  %v731_v4 = vsel %vm59_vm1, %v708_v39, 0.0  ;;  %v711_v40 = vld [vmem:[#allocation3 + $0x58] sm:$0xff] }
 0x113   :  { %v586_v7 = vpop.permute.xlu1 %585  ;;  %637 = vst.msk [vmem:[#allocation3 + $0x78] sm:$0xff] %vm59_vm1, %v620_v37  ;;  %v732_v41 = vadd.f32 %v731_v4, %v730_v9  ;;  %v737_v47 = vsel %vm59_vm1, %v711_v40, 0.0 }
 0x114   :  { %v619_v42 = vadd.f32 %v586_v7, %v523_v36  ;;  %v687_v43 = vadd.f32 %v686_v33, %v685_v61 }
 0x115   :  { %v710_v44 = vld [vmem:[#allocation3 + $0x50] sm:$0xff]  ;;  %v734_v45 = vadd.f32 %v733_v19, %v732_v41 }
 0x116   :  { %636 = vst.msk [vmem:[#allocation3 + $0x70] sm:$0xff] %vm59_vm1, %v619_v42  ;;  %688 = vadd.xlane.f32.xlu1 %v687_v43  ;;  %v735_v46 = vsel %vm59_vm1, %v710_v44, 0.0  ;;  %v713_v10 = vld [vmem:[#allocation3 + $0x68] sm:$0xff] }
 0x117   :  { %v736_v48 = vadd.f32 %v735_v46, %v734_v45  ;;  %v741_v53 = vsel %vm59_vm1, %v713_v10, 0.0 }
 0x119   :  { %v712_v50 = vld [vmem:[#allocation3 + $0x60] sm:$0xff]  ;;  %v738_v51 = vadd.f32 %v737_v47, %v736_v48 }
 0x11a   :  { %v739_v52 = vsel %vm59_vm1, %v712_v50, 0.0  ;;  %v715_v54 = vld [vmem:[#allocation3 + $0x78] sm:$0xff] }
 0x11b   :  { %v740_v0 = vadd.f32 %v739_v52, %v738_v51  ;;  %v745_v30 = vsel %vm59_vm1, %v715_v54, 0.0 }
 0x11d   :  { %v714_v55 = vld [vmem:[#allocation3 + $0x70] sm:$0xff]  ;;  %v742_v56 = vadd.f32 %v741_v53, %v740_v0 }
 0x11e   :  { %v743_v13 = vsel %vm59_vm1, %v714_v55, 0.0 }
 0x11f   :  { %v744_v57 = vadd.f32 %v743_v13, %v742_v56 }
 0x121   :  { %v746_v58 = vadd.f32 %v745_v30, %v744_v57 }
 0x123   :  { %747 = vadd.xlane.f32.xlu0 %v746_v58 }
 0x1a3   :  { %v689_v2 = vpop.xlane.xlu1 %688 }
 0x1a4   :  { %v690_v28 = vrot.slane %v689_v2, 4 }
 0x1a6   :  { %v691_v32 = vadd.f32 %v690_v28, %v689_v2 }
 0x1a8   :  { %v692_v59 = vrot.slane %v691_v32, 2 }
 0x1aa   :  { %v693_v60 = vadd.f32 %v692_v59, %v691_v32 }
 0x1ac   :  { %v694_v1 = vrot.slane %v693_v60, 1 }
 0x1ae   :  { %v695_v62 = vadd.f32 %v694_v1, %v693_v60 }
 0x1b0   :  { %v748_v63 = vpop.xlane.xlu0 %747  ;;  %792 = vpush %v695_v62 }
 0x1b1   :  { %v749_v3 = vrot.slane %v748_v63, 4 }
 0x1b3   :  { %v750_v14 = vadd.f32 %v749_v3, %v748_v63 }
 0x1b5   :  { %v751_v17 = vrot.slane %v750_v14, 2 }
 0x1b7   :  { %v752_v18 = vadd.f32 %v751_v17, %v750_v14 }
 0x1b9   :  { %v753_v20 = vrot.slane %v752_v18, 1 }
 0x1bb   :  { %v754_v5 = vadd.f32 %v753_v20, %v752_v18 }
 0x1bd   :  { %794 = vpush %v754_v5 }
 0x1e1   :  { %s793_s0 = spop %792 }
 0x1e2   :  { %v697_v6 = vstv %s793_s0 }
 0x1e3   :  { %699 = vst.msk [vmem:[#allocation4] sm:$0x1] %vm698_vm5, %v697_v6 }
 0x1e4   :  { %815 = shalt.err (!%p812_p4)
}
 0x1e5   :  { %s816_s28 = scalar_lea.hbm %s1349_s2, 16 }
 0x1e6   :  { %p817_p5 = scmp.ne.s32.totalorder %s1349_s2, %s816_s28  ;;  %p820_p6 = scmp.lt.u32.totalorder %s816_s28, %s1349_s2 }
 0x1e8   :  { %p822_p7 = pnand %p820_p6, %p817_p5 }
 0x1ea   :  { %825 = shalt.err (!%p822_p7)
}
 0x1eb   :  { %767 = dma.vmem_to_hbm [thread:$0]  %s765_s24, 16, %s1349_s2, [#allocation5]  }
 0x1ec   :  { %s857_s8 = smov [#allocation6]  }
 0x1ed   :  { %s774_s9 = sshll.u32 %s857_s8, 4  ;;  %s775_s9 = int_to_ptr.vmem [resolvable:$true] %s774_s9 }
 0x1ee   :  { %s795_s10 = spop %794  ;;  %s826_s11 = scalar_lea.vmem %s775_s9, 16 }
 0x1ef   :  { %v756_v21 = vstv %s795_s10  ;;  %p827_p8 = scmp.ne.s32.totalorder %s775_s9, %s826_s11  ;;  %s830_s12 = scalar_lea.vmem %s775_s9, 32 }
 0x1f0   :  { %757 = vst.msk [vmem:[#allocation6] sm:$0x1] %vm698_vm5, %v756_v21  ;;  %p831_p9 = scmp.lt.s32.totalorder %s775_s9, %s775_s9  ;;  %p832_p10 = scmp.lt.s32.totalorder %s830_s12, %s826_s11 }
 0x1f2   :  { %p833_p11 = por %p832_p10, %p831_p9 }
 0x1f4   :  { %p834_p12 = pnand %p833_p11, %p827_p8 }
 0x1f6   :  { %837 = shalt.err (!%p834_p12)
}
 0x1f7   :  { %s838_s15 = scalar_lea.hbm %s1350_s3, 16 }
 0x1f8   :  { %p839_p13 = scmp.ne.s32.totalorder %s1350_s3, %s838_s15  ;;  %p842_p0 = scmp.lt.u32.totalorder %s838_s15, %s1350_s3 }
 0x1fa   :  { %p844_p1 = pnand %p842_p0, %p839_p13 }
 0x1fc   :  { %847 = shalt.err (!%p844_p1)
}
 0x1fd   :  { %777 = dma.vmem_to_hbm [thread:$0]  %s775_s9, 16, %s1350_s3, [#allocation7]  }
 0x1fe   :  { %848 = dma.done.wait [#allocation5], 16  }
 0x1ff   :  { %849 = vsyncadd [#allocation5], 4294967280 }
 0x200   :  { %850 = dma.done.wait [#allocation7], 16  }
 0x201   :  { %851 = vsyncadd [#allocation7], 4294967280 }
 0x202   :  { %784 = vsyncpa [#allocation5], 1 }
 0x203   :  { %785 = vsyncpa [#allocation7], 1 }

</bundles_post_ra>
